<compile_context>
chip_gen: v7x
topology: tpu7x:2x2x1
jax: 0.10.0
libtpu: 0.0.40
codegen_flags: <defaults>
</compile_context>

<pallas_src>
from typing import NamedTuple, Sequence, Tuple

import numpy as np
import jax
import jax.numpy as jnp
from jax.experimental import pallas as pl
from jax.experimental.pallas import tpu as pltpu


# ----------------------------------------------------------------------------
# Fused Pallas kernel: all feature levels in one call.
# ----------------------------------------------------------------------------
def _choose_tile(hws, cap=8192):
    """Lane tile: power of two, >=128, big enough for the largest level
    (capped so per-level padding waste stays small)."""
    max_hw = max(hws)
    t = 128
    while t < max_hw and t < cap:
        t *= 2
    return t


def _make_fused_kernel(level_params, tile, n_levels):
    """Kernel writing one (ROWS, tile) lane-dense block of the fused slab.

    level_params[l] holds compile-time constants:
      block_start : first grid-block index of level l
      W, inv_W    : grid width and its reciprocal (float)
      sh, sw      : stride_h, stride_w (float)
    """

    def kernel(*refs):
        out_ref = refs[-1]
        base_refs = refs[:n_levels]          # each (ROWS, 1) f32 in VMEM
        rows = out_ref.shape[0]
        j = pl.program_id(0)

        # --- select this block's level constants (scalar compares only) ----
        p0 = level_params[0]
        w = jnp.float32(p0["W"])
        inv_w = jnp.float32(p0["inv_W"])
        sh = jnp.float32(p0["sh"])
        sw = jnp.float32(p0["sw"])
        start = (j - p0["block_start"]).astype(jnp.float32) * jnp.float32(tile)
        base = base_refs[0][...]             # (ROWS, 1)
        for l in range(1, n_levels):
            p = level_params[l]
            sel = j >= p["block_start"]
            w = jnp.where(sel, jnp.float32(p["W"]), w)
            inv_w = jnp.where(sel, jnp.float32(p["inv_W"]), inv_w)
            sh = jnp.where(sel, jnp.float32(p["sh"]), sh)
            sw = jnp.where(sel, jnp.float32(p["sw"]), sw)
            start = jnp.where(
                sel,
                (j - p["block_start"]).astype(jnp.float32) * jnp.float32(tile),
                start)
            base = jnp.where(sel, base_refs[l][...], base)

        # --- flat location index -> (row, col) without integer div/mod -----
        lane = jax.lax.broadcasted_iota(jnp.int32, (1, tile), 1)
        q = lane.astype(jnp.float32) + start            # level-local flat idx
        row = jnp.floor((q + jnp.float32(0.5)) * inv_w)
        col = q - row * w
        neg = col < 0.0                                  # exact +/-1 fixup
        row = jnp.where(neg, row - 1.0, row)
        col = jnp.where(neg, col + w, col)
        ovr = col >= w
        row = jnp.where(ovr, row + 1.0, row)
        col = jnp.where(ovr, col - w, col)

        shift_x = col * sw                               # (1, tile)
        shift_y = row * sh                               # (1, tile)

        # rows a*4+c: c even -> x shift, c odd -> y shift
        sub = jax.lax.broadcasted_iota(jnp.int32, (rows, tile), 0)
        shift = jnp.where((sub & 1) == 0, shift_x, shift_y)   # (rows, tile)

        # single full-block store
        out_ref[...] = shift + base                      # base broadcasts on lanes

    return kernel


def _grid_anchors_fused(cell_anchors, grid_sizes, strides):
    """Returns a list (per level) of anchors in PyTorch layout (H*W*A, 4)."""
    n_levels = len(cell_anchors)
    a_list = [int(b.shape[0]) for b in cell_anchors]
    rows = max(a_list) * 4                     # sublane extent == full array dim
    hws = [int(h) * int(w) for (h, w) in grid_sizes]
    tile = _choose_tile(hws)

    n_blocks = [(hw + tile - 1) // tile for hw in hws]
    block_starts = [int(x) for x in np.cumsum([0] + n_blocks[:-1])]
    total_blocks = int(sum(n_blocks))
    total_cols = total_blocks * tile

    level_params = []
    for (gh, gw), (sh, sw), bs in zip(grid_sizes, strides, block_starts):
        level_params.append(dict(block_start=int(bs),
                                 W=float(gw), inv_W=float(1.0 / float(gw)),
                                 sh=float(sh), sw=float(sw)))

    # Per-level base-anchor column: row a*4+c = base[a, c]; pad to `rows`.
    base_cols = []
    for b, a in zip(cell_anchors, a_list):
        col = np.zeros((rows, 1), np.float32)
        col[:a * 4, 0] = np.asarray(b, np.float32).reshape(-1)
        base_cols.append(jnp.asarray(col))

    kernel = _make_fused_kernel(level_params, tile, n_levels)

    slab = pl.pallas_call(
        kernel,
        out_shape=jax.ShapeDtypeStruct((rows, total_cols), jnp.float32),
        grid=(total_blocks,),
        in_specs=[pl.BlockSpec((rows, 1), lambda j: (0, 0))
                  for _ in range(n_levels)],
        out_specs=pl.BlockSpec((rows, tile), lambda j: (0, j)),
        compiler_params=pltpu.CompilerParams(
            dimension_semantics=("parallel",)),   # disjoint output tiles
    )(*base_cols)

    # Rearrange lane-dense slab to the PyTorch (H*W*A, 4) layout per level.
    # (N, 4) is intrinsically lane-sparse; this stays in plain JAX.
    outs = []
    for (gh, gw), a, bs in zip(grid_sizes, a_list, block_starts):
        hw = int(gh) * int(gw)
        off = bs * tile
        lv = slab[:a * 4, off:off + hw]                       # (A*4, HW)
        outs.append(lv.reshape(a, 4, hw).transpose(2, 0, 1).reshape(-1, 4))
    return outs


# ----------------------------------------------------------------------------
# Module-equivalent wrapper.
# ----------------------------------------------------------------------------
class ImageList(NamedTuple):
    tensors: jax.Array                      # (N, C, H, W)
    image_sizes: Sequence[Tuple[int, int]]  # per-image (h, w)


class AnchorGeneratorPallas:
    def __init__(self, sizes=(128, 256, 512), aspect_ratios=(0.5, 1.0, 2.0)):
        if not isinstance(sizes[0], (list, tuple)):
            sizes = tuple((s,) for s in sizes)
        if not isinstance(aspect_ratios[0], (list, tuple)):
            aspect_ratios = (aspect_ratios,) * len(sizes)
        assert len(sizes) == len(aspect_ratios)
        self.sizes = sizes
        self.aspect_ratios = aspect_ratios
        self.cell_anchors = None            # numpy, baked into the kernel
        self._cache = {}

    @staticmethod
    def generate_anchors(scales, aspect_ratios) -> np.ndarray:
        scales = np.asarray(scales, np.float32)
        aspect_ratios = np.asarray(aspect_ratios, np.float32)
        h_ratios = np.sqrt(aspect_ratios)
        w_ratios = 1.0 / h_ratios
        ws = (w_ratios[:, None] * scales[None, :]).reshape(-1)
        hs = (h_ratios[:, None] * scales[None, :]).reshape(-1)
        base_anchors = np.stack([-ws, -hs, ws, hs], axis=1) / 2.0
        return np.round(base_anchors).astype(np.float32)

    def set_cell_anchors(self):
        if self.cell_anchors is not None:
            return
        self.cell_anchors = [
            self.generate_anchors(s, a)
            for s, a in zip(self.sizes, self.aspect_ratios)
        ]

    def num_anchors_per_location(self):
        return [len(s) * len(a) for s, a in zip(self.sizes, self.aspect_ratios)]

    def grid_anchors(self, grid_sizes, strides):
        return _grid_anchors_fused(self.cell_anchors, grid_sizes, strides)

    def cached_grid_anchors(self, grid_sizes, strides):
        key = tuple(grid_sizes) + tuple(strides)
        if key in self._cache:
            return self._cache[key]
        per_level = self.grid_anchors(grid_sizes, strides)
        concat = (jnp.concatenate(per_level, axis=0)
                  if len(per_level) > 1 else per_level[0])
        self._cache[key] = (per_level, concat)
        return self._cache[key]

    def __call__(self, image_list: ImageList, feature_maps):
        grid_sizes = tuple(tuple(int(x) for x in fm.shape[-2:])
                           for fm in feature_maps)
        image_size = image_list.tensors.shape[-2:]
        # NOTE: the reference module uses true division here (not torchvision's
        # floor division); we match the reference module exactly.
        strides = tuple(
            (image_size[0] / g[0], image_size[1] / g[1]) for g in grid_sizes
        )
        self.set_cell_anchors()
        _, anchors_all = self.cached_grid_anchors(grid_sizes, strides)
        # Anchors are image-independent: build once, reuse for every image.
        return [anchors_all for _ in image_list.image_sizes]


# ----------------------------------------------------------------------------
# Pure-numpy reference (mirrors the PyTorch semantics) for verification.
# ----------------------------------------------------------------------------
def _ref_anchors(sizes, aspect_ratios, grid_sizes, strides):
    outs = []
    for scales, ars, (gh, gw), (sh, sw) in zip(sizes, aspect_ratios,
                                               grid_sizes, strides):
        scales = np.asarray(scales, np.float32)
        ars = np.asarray(ars, np.float32)
        h_r = np.sqrt(ars)
        w_r = 1.0 / h_r
        ws = (w_r[:, None] * scales[None, :]).reshape(-1)
        hs = (h_r[:, None] * scales[None, :]).reshape(-1)
        base = np.round(np.stack([-ws, -hs, ws, hs], 1) / 2.0)
        sx = np.arange(gw, dtype=np.float32) * sw
        sy = np.arange(gh, dtype=np.float32) * sh
        shift_y, shift_x = np.meshgrid(sy, sx, indexing="ij")
        shift_x = shift_x.reshape(-1)
        shift_y = shift_y.reshape(-1)
        shifts = np.stack([shift_x, shift_y, shift_x, shift_y], 1)
        outs.append((shifts[:, None, :] + base[None, :, :]).reshape(-1, 4))
    return np.concatenate(outs, axis=0)


# ----------------------------------------------------------------------------
if __name__ == "__main__":
    key = jax.random.PRNGKey(0)
    k0, k1, k2, k3 = jax.random.split(key, 4)

    # Small, forward-consistent shapes: 2 images of 64x64, 3 feature maps
    # (one per anchor size), NCHW.
    batch, chans, img_h, img_w = 2, 4, 64, 64
    images = jax.random.normal(k0, (batch, chans, img_h, img_w), jnp.float32)
    feature_maps = [
        jax.random.normal(k1, (batch, chans, 16, 16), jnp.float32),
        jax.random.normal(k2, (batch, chans, 8, 8), jnp.float32),
        jax.random.normal(k3, (batch, chans, 4, 4), jnp.float32),
    ]
    image_list = ImageList(tensors=images,
                           image_sizes=[(img_h, img_w)] * batch)

    gen = AnchorGeneratorPallas(sizes=(128, 256, 512),
                                aspect_ratios=(0.5, 1.0, 2.0))
    anchors = gen(image_list, feature_maps)
    anchors = [jax.block_until_ready(a) for a in anchors]

    # Verify against the pure-numpy reference of the PyTorch semantics.
    grid_sizes = tuple(tuple(fm.shape[-2:]) for fm in feature_maps)
    strides = tuple((img_h / g[0], img_w / g[1]) for g in grid_sizes)
    ref = _ref_anchors(gen.sizes, gen.aspect_ratios, grid_sizes, strides)

    assert len(anchors) == batch
    for a in anchors:
        assert a.shape == ref.shape and a.dtype == jnp.float32
        np.testing.assert_allclose(np.asarray(a), ref, rtol=0, atol=1e-4)

    print("KERNEL_OK")
</pallas_src>

<mosaic_0001>
module attributes {stable_mosaic.version = 11 : i64} {
  func.func @kernel(%arg0: i32, %arg1: memref<12x1xf32, #tpu.memory_space<vmem>>, %arg2: memref<12x1xf32, #tpu.memory_space<vmem>>, %arg3: memref<12x1xf32, #tpu.memory_space<vmem>>, %arg4: memref<12x256xf32, #tpu.memory_space<vmem>>) attributes {dimension_semantics = [#tpu.dimension_semantics<parallel>], iteration_bounds = array<i64: 3>, scalar_prefetch = 0 : i64, scratch_operands = 0 : i64, tpu.core_type = #tpu.core_type<tc>, window_params = [{pipeline_mode = #tpu.pipeline_mode<synchronous>, transform_indices = @transform_0, window_bounds = array<i64: 12, 1>}, {pipeline_mode = #tpu.pipeline_mode<synchronous>, transform_indices = @transform_1, window_bounds = array<i64: 12, 1>}, {pipeline_mode = #tpu.pipeline_mode<synchronous>, transform_indices = @transform_2, window_bounds = array<i64: 12, 1>}, {transform_indices = @transform_3, window_bounds = array<i64: 12, 256>}]} {
    %c0_i32 = arith.constant 0 : i32
    %0 = arith.subi %arg0, %c0_i32 : i32
    %1 = arith.sitofp %0 : i32 to f32
    %cst = arith.constant 2.560000e+02 : f32
    %2 = arith.mulf %1, %cst : f32
    %c0 = arith.constant 0 : index
    %c0_0 = arith.constant 0 : index
    %3 = vector.load %arg1[%c0, %c0_0] : memref<12x1xf32, #tpu.memory_space<vmem>>, vector<12x1xf32>
    %c1_i32 = arith.constant 1 : i32
    %4 = arith.cmpi sge, %arg0, %c1_i32 : i32
    %cst_1 = arith.constant 8.000000e+00 : f32
    %cst_2 = arith.constant 1.600000e+01 : f32
    %5 = arith.select %4, %cst_1, %cst_2 : f32
    %cst_3 = arith.constant 1.250000e-01 : f32
    %cst_4 = arith.constant 6.250000e-02 : f32
    %6 = arith.select %4, %cst_3, %cst_4 : f32
    %cst_5 = arith.constant 8.000000e+00 : f32
    %cst_6 = arith.constant 4.000000e+00 : f32
    %7 = arith.select %4, %cst_5, %cst_6 : f32
    %cst_7 = arith.constant 8.000000e+00 : f32
    %cst_8 = arith.constant 4.000000e+00 : f32
    %8 = arith.select %4, %cst_7, %cst_8 : f32
    %c1_i32_9 = arith.constant 1 : i32
    %9 = arith.subi %arg0, %c1_i32_9 : i32
    %10 = arith.sitofp %9 : i32 to f32
    %cst_10 = arith.constant 2.560000e+02 : f32
    %11 = arith.mulf %10, %cst_10 : f32
    %12 = arith.select %4, %11, %2 : f32
    %c0_11 = arith.constant 0 : index
    %c0_12 = arith.constant 0 : index
    %13 = vector.load %arg2[%c0_11, %c0_12] : memref<12x1xf32, #tpu.memory_space<vmem>>, vector<12x1xf32>
    %14 = arith.select %4, %13, %3 : vector<12x1xf32>
    %c2_i32 = arith.constant 2 : i32
    %15 = arith.cmpi sge, %arg0, %c2_i32 : i32
    %cst_13 = arith.constant 4.000000e+00 : f32
    %16 = arith.select %15, %cst_13, %5 : f32
    %cst_14 = arith.constant 2.500000e-01 : f32
    %17 = arith.select %15, %cst_14, %6 : f32
    %cst_15 = arith.constant 1.600000e+01 : f32
    %18 = arith.select %15, %cst_15, %7 : f32
    %cst_16 = arith.constant 1.600000e+01 : f32
    %19 = arith.select %15, %cst_16, %8 : f32
    %c2_i32_17 = arith.constant 2 : i32
    %20 = arith.subi %arg0, %c2_i32_17 : i32
    %21 = arith.sitofp %20 : i32 to f32
    %cst_18 = arith.constant 2.560000e+02 : f32
    %22 = arith.mulf %21, %cst_18 : f32
    %23 = arith.select %15, %22, %12 : f32
    %c0_19 = arith.constant 0 : index
    %c0_20 = arith.constant 0 : index
    %24 = vector.load %arg3[%c0_19, %c0_20] : memref<12x1xf32, #tpu.memory_space<vmem>>, vector<12x1xf32>
    %25 = arith.select %15, %24, %14 : vector<12x1xf32>
    %26 = tpu.iota {dimensions = array<i32: 1>} : vector<1x256xi32>
    %27 = arith.sitofp %26 : vector<1x256xi32> to vector<1x256xf32>
    %28 = vector.broadcast %23 : f32 to vector<1x256xf32>
    %29 = arith.addf %27, %28 : vector<1x256xf32>
    %cst_21 = arith.constant 5.000000e-01 : f32
    %30 = vector.broadcast %cst_21 : f32 to vector<1x256xf32>
    %31 = arith.addf %29, %30 : vector<1x256xf32>
    %32 = vector.broadcast %17 : f32 to vector<1x256xf32>
    %33 = arith.mulf %31, %32 : vector<1x256xf32>
    %34 = math.floor %33 : vector<1x256xf32>
    %35 = vector.broadcast %16 : f32 to vector<1x256xf32>
    %36 = arith.mulf %34, %35 : vector<1x256xf32>
    %37 = arith.subf %29, %36 : vector<1x256xf32>
    %cst_22 = arith.constant 0.000000e+00 : f32
    %38 = vector.broadcast %cst_22 : f32 to vector<1x256xf32>
    %39 = arith.cmpf olt, %37, %38 : vector<1x256xf32>
    %cst_23 = arith.constant 1.000000e+00 : f32
    %40 = vector.broadcast %cst_23 : f32 to vector<1x256xf32>
    %41 = arith.subf %34, %40 : vector<1x256xf32>
    %42 = arith.select %39, %41, %34 : vector<1x256xi1>, vector<1x256xf32>
    %43 = vector.broadcast %16 : f32 to vector<1x256xf32>
    %44 = arith.addf %37, %43 : vector<1x256xf32>
    %45 = arith.select %39, %44, %37 : vector<1x256xi1>, vector<1x256xf32>
    %46 = vector.broadcast %16 : f32 to vector<1x256xf32>
    %47 = arith.cmpf oge, %45, %46 : vector<1x256xf32>
    %cst_24 = arith.constant 1.000000e+00 : f32
    %48 = vector.broadcast %cst_24 : f32 to vector<1x256xf32>
    %49 = arith.addf %42, %48 : vector<1x256xf32>
    %50 = arith.select %47, %49, %42 : vector<1x256xi1>, vector<1x256xf32>
    %51 = vector.broadcast %16 : f32 to vector<1x256xf32>
    %52 = arith.subf %45, %51 : vector<1x256xf32>
    %53 = arith.select %47, %52, %45 : vector<1x256xi1>, vector<1x256xf32>
    %54 = vector.broadcast %19 : f32 to vector<1x256xf32>
    %55 = arith.mulf %53, %54 : vector<1x256xf32>
    %56 = vector.broadcast %18 : f32 to vector<1x256xf32>
    %57 = arith.mulf %50, %56 : vector<1x256xf32>
    %58 = tpu.iota {dimensions = array<i32: 0>} : vector<12x256xi32>
    %c1_i32_25 = arith.constant 1 : i32
    %59 = vector.broadcast %c1_i32_25 : i32 to vector<12x256xi32>
    %60 = arith.andi %58, %59 : vector<12x256xi32>
    %c0_i32_26 = arith.constant 0 : i32
    %61 = vector.broadcast %c0_i32_26 : i32 to vector<12x256xi32>
    %62 = arith.cmpi eq, %60, %61 : vector<12x256xi32>
    %63 = vector.shape_cast %55 : vector<1x256xf32> to vector<1x256xf32>
    %64 = vector.broadcast %63 : vector<1x256xf32> to vector<12x256xf32>
    %65 = vector.shape_cast %57 : vector<1x256xf32> to vector<1x256xf32>
    %66 = vector.broadcast %65 : vector<1x256xf32> to vector<12x256xf32>
    %67 = arith.select %62, %64, %66 : vector<12x256xi1>, vector<12x256xf32>
    %68 = vector.broadcast %25 : vector<12x1xf32> to vector<12x256xf32>
    %69 = arith.addf %67, %68 : vector<12x256xf32>
    %c0_27 = arith.constant 0 : index
    %c0_28 = arith.constant 0 : index
    %70 = vector.load %arg4[%c0_27, %c0_28] : memref<12x256xf32, #tpu.memory_space<vmem>>, vector<12x256xf32>
    tpu.vector_store %arg4[%c0_27, %c0_28], %69 {strides = array<i32>} : memref<12x256xf32, #tpu.memory_space<vmem>>, vector<12x256xf32>,
    return
  }
  func.func @transform_0(%arg0: i32) -> (i32, i32) {
    %c0_i32 = arith.constant 0 : i32
    %c0_i32_0 = arith.constant 0 : i32
    %c0_i32_1 = arith.constant 0 : i32
    return %c0_i32, %c0_i32_0 : i32, i32
  }
  func.func @transform_1(%arg0: i32) -> (i32, i32) {
    %c0_i32 = arith.constant 0 : i32
    %c0_i32_0 = arith.constant 0 : i32
    %c0_i32_1 = arith.constant 0 : i32
    return %c0_i32, %c0_i32_0 : i32, i32
  }
  func.func @transform_2(%arg0: i32) -> (i32, i32) {
    %c0_i32 = arith.constant 0 : i32
    %c0_i32_0 = arith.constant 0 : i32
    %c0_i32_1 = arith.constant 0 : i32
    return %c0_i32, %c0_i32_0 : i32, i32
  }
  func.func @transform_3(%arg0: i32) -> (i32, i32) {
    %c0_i32 = arith.constant 0 : i32
    %c0_i32_0 = arith.constant 0 : i32
    return %c0_i32, %arg0 : i32, i32
  }
}

</mosaic_0001>

<bundles_post_ra>
// kernel: tpu_custom_call.1
= control target key start
LH: loop header
LB: loop body
LE: loop exit
PB: predicated region body
PF: predicated region fallthrough
CT: control target
= control target key end

     0   :  { %8 = vsyncpa [#allocation3], 0  ;;  %s637_s0 = inlined_call_operand.vmem [shape: f32[12,1], index: 0, kind: input, shape index: {}]   ;;  %s638_s1 = inlined_call_operand.vmem [shape: f32[12,1], index: 1, kind: input, shape index: {}]   ;;  %s639_s2 = inlined_call_operand.vmem [shape: f32[12,1], index: 2, kind: input, shape index: {}]   ;;  %s640_s3 = inlined_call_operand.hbm [shape: f32[12,768], index: 3, kind: output, shape index: {}]  }
   0x1   :  { %10 = vsyncpa [#allocation3 + $0x1], 0  ;;  %s469_s12 = smov 0   ;;  %s471_s13 = smov 0  }
   0x2   :  { %s473_s14 = smov 0   ;;  %s475_s15 = smov 0  }
   0x3 LB: > { %s490_s16 = sadd.s32 4294967295, %s442_s15   ;;  %s322_s17 = sadd.s32 4294967294, %s442_s15   ;;  %s442_s15 = sphi %s475_s15, %s652_s15   ;;  %s438_s14 = sphi %s473_s14, %s651_s14   ;;  %s434_s13 = sphi %s471_s13, %s650_s13   ;;  %s430_s12 = sphi %s469_s12, %s649_s12  }
   0x4   : > { %s494_s18 = sadd.s32 1, %s442_s15   ;;  %s86_s19 = sadd.s32 1, %s438_s14 }
   0x5   : > { %s83_s20 = ssub.s32 %s442_s15, %s494_s18  ;;  %p96_p0 = scmp.ne.s32.totalorder %s438_s14, %s434_s13 }
   0x6   : > { %p84_p1 = scmp.eq.s32.totalorder %s83_s20, 0  ;;  %p97_p2 = scmp.eq.s32.totalorder %s490_s16, 2 }
   0x7   : > { %p102_p3 = scmp.ne.s32.totalorder %s434_s13, %s430_s12  ;;  %p103_p4 = scmp.eq.s32.totalorder %s322_s17, 2 }
   0x8   : > { %s505_s21 = scalar_select %p84_p1, %s438_s14, %s86_s19  }
   0x9   : > { %p507_p5 = por %p97_p2, %p96_p0  ;;  %p511_p6 = por %p103_p4, %p102_p3 }
   0xa   : > { %p324_p7 = scmp.ge.s32.totalorder %s442_s15, 1  ;;  %p130_p8 = scmp.lt.s32.totalorder %s442_s15, 4 }
   0xc   : > { %p131_p9 = pnand %p324_p7, %p130_p8 }
   0xd   : > { %p154_p10 = scmp.ge.s32.totalorder (!%p131_p9), %s490_s16, 1  ;;  %p169_p11 = scmp.ge.s32.totalorder (!%p131_p9), %s490_s16, 2  ;;  %v444_v0 = vmov (!%p131_p9), 0   ;;  %v152_v1 = vld [vmem:[%s637_s0] sm:$0xff] (!%p131_p9)  ;;  %v153_v3 = vld [vmem:[%s637_s0 + $0x8] sm:$0xf] (!%p131_p9)  ;;  %v184_v9 = vlaneseq (!%p131_p9) }
   0xe   : > { %134 = sbr.rel (%p131_p9) target bundleno = 177 (0xb1), region = 32  ;;  %379 = vset.pattern.permute.xlu0 (!%p131_p9), %v444_v0  ;;  %v162_v2 = vld [vmem:[%s638_s1] sm:$0xff] (!%p131_p9)  ;;  %v163_v4 = vld [vmem:[%s638_s1 + $0x8] sm:$0xf] (!%p131_p9)  ;;  %s326_s20 = sadd.s32 (!%p131_p9), 4294967295, %s490_s16 }
   0xf   : > { %v177_v6 = vld [vmem:[%s639_s2] sm:$0xff] (!%p131_p9)  ;;  %v178_v12 = vld [vmem:[%s639_s2 + $0x8] sm:$0xf] (!%p131_p9)  ;;  %s327_s24 = sadd.s32 (!%p131_p9), 4294967294, %s490_s16  ;;  %s159_s25 = scvt.s32.f32 (!%p131_p9), %s326_s20  ;;  %v185_v15 = vand.u32 (!%p131_p9), 127, %v184_v9  ;;  %v230_v28 = vshrl.u32 (!%p131_p9), %v184_v9, 7 }
  0x10   : > { %s174_s26 = scvt.s32.f32 (!%p131_p9), %s327_s24  ;;  %s146_s4 = sand.u32 (!%p131_p9), 1, %s434_s13  }
  0x11   : > { %s160_s27 = smul.f32 (!%p131_p9), 256.0, %s159_s25  ;;  %v186_v16 = vadd.s32 (!%p131_p9), 128, %v185_v15  ;;  %v187_v17 = vcvt.s32.f32 (!%p131_p9), %v185_v15  ;;  %v231_v31 = vadd.s32 (!%p131_p9), 8, %v230_v28  ;;  %v232_v38 = vand.u32 (!%p131_p9), 1, %v230_v28  ;;  %s325_s5 = sshll.u32 (!%p131_p9), %s146_s4, 5 }
  0x12   : > { %s148_s6 = scalar_lea.vmem (!%p131_p9), [#allocation2], %s325_s5  ;;  %s335_s8 = sshll.u32 (!%p131_p9), %s490_s16, 8 }
  0x13   : > { %v188_v18 = vcvt.s32.f32 (!%p131_p9), %v186_v16  ;;  %v233_v39 = vand.u32 (!%p131_p9), 1, %v231_v31  ;;  %vm571_vm6 = vcmp.eq.s32.totalorder (!%p131_p9), %v232_v38, 0  ;;  %s272_s7 = sshll.u32 (!%p131_p9), %s148_s6, 4  ;;  %s594_s11 = scalar_lea.hbm (!%p131_p9), %s640_s3, %s335_s8  ;;  %s589_s7 = int_to_ptr.vmem [resolvable:$true] %s272_s7 }
  0x14   : > { %s596_s17 = scalar_lea.sflag (!%p131_p9), [#allocation3], %s146_s4 }
  0x15   : > { %s164_s28 = scalar_select %p154_p10, 1, 0  ;;  %vm575_vm7 = vcmp.eq.s32.totalorder %v233_v39, 0 }
  0x16   : > { %s179_s29 = scalar_select %p169_p11, 1, 0 }
  0x17   : > { %v165_v5 = vstv %s164_s28  ;;  %s155_s9 = scalar_select %p154_p10, 8.0, 16.0 }
  0x18   : > { %vm540_vm0 = vcmp.eq.s32.totalorder %v165_v5, 1  ;;  %v180_v8 = vstv %s179_s29  ;;  %s156_s10 = scalar_select %p154_p10, 0.125, 0.0625 }
  0x19   : > { %v167_v10 = vsel %vm540_vm0, %v162_v2, %v152_v1  ;;  %vm181_vm1 = vcmp.eq.s32.totalorder %v180_v8, 1  ;;  %v168_v11 = vsel %vm540_vm0, %v163_v4, %v153_v3  ;;  %s157_s19 = scalar_select %p154_p10, 8.0, 4.0 }
  0x1a   : > { %v182_v13 = vsel %vm181_vm1, %v177_v6, %v167_v10  ;;  %v183_v14 = vsel %vm181_vm1, %v178_v12, %v168_v11  ;;  %s654_s9 = smov (%p169_p11, %s155_s9), 4.0  ;;  %s150_s28 = scvt.s32.f32 %s490_s16 }
  0x1b   : > { %242 = vperm.xlu0 %379, %v182_v13   ;;  %s656_s10 = smov (%p169_p11, %s156_s10), 0.25  ;;  %s658_s19 = smov (%p169_p11, %s157_s19), 16.0  ;;  %v199_v27 = vstv %s654_s9 }
  0x1c   : > { %s175_s29 = smul.f32 256.0, %s174_s26  ;;  %v194_v22 = vstv %s656_s10  ;;  %v224_v42 = vstv %s658_s19  ;;  %s380_s16 = scalar_lea.vmem %s589_s7, 512 }
  0x1d   : > { %s151_s30 = smul.f32 256.0, %s150_s28  ;;  %p381_p12 = scmp.ne.s32.totalorder %s589_s7, %s380_s16 }
  0x1e   : > { %s445_s19 = smov [#allocation2]  }
  0x1f   : > { %247 = vperm.xlu0 %379, %v183_v14   ;;  %s660_s27 = smov (!%p154_p10, %s160_s27), %s151_s30  ;;  %p382_p13 = pnand %p381_p12, %p507_p5 }
  0x20   : > { %s662_s29 = smov (!%p169_p11, %s175_s29), %s660_s27  ;;  %s384_s20 = sshll.u32 %s445_s19, 4  ;;  %s385_s20 = int_to_ptr.vmem [resolvable:$false] %s384_s20 }
  0x21   : > { %v189_v19 = vstv %s662_s29  ;;  %p383_p0 = pneg %p382_p13  ;;  %s386_s24 = scalar_lea.vmem %s385_s20, 1024 }
  0x22   : > { %v190_v20 = vadd.f32 %v189_v19, %v187_v17  ;;  %v191_v21 = vadd.f32 %v189_v19, %v188_v18  ;;  %p387_p1 = scmp.lt.s32.totalorder %s589_s7, %s385_s20  ;;  %p388_p2 = scmp.lt.s32.totalorder %s386_s24, %s380_s16 }
  0x24   : > { %v192_v23 = vadd.f32 0.5, %v190_v20  ;;  %v193_v24 = vadd.f32 0.5, %v191_v21  ;;  %p389_p3 = por %p388_p2, %p387_p1 }
  0x26   : > { %v195_v25 = vmul.f32 %v194_v22, %v192_v23  ;;  %v196_v26 = vmul.f32 %v194_v22, %v193_v24  ;;  %p390_p4 = pnand %p389_p3, %p383_p0 }
  0x28   : > { %v197_v29 = vfloor.f32 %v195_v25  ;;  %v198_v30 = vfloor.f32 %v196_v26 }
  0x2a   : > { %v200_v32 = vmul.f32 %v199_v27, %v197_v29  ;;  %v201_v33 = vmul.f32 %v199_v27, %v198_v30  ;;  %v328_v34 = vadd.f32 -1.0, %v197_v29  ;;  %v329_v35 = vadd.f32 -1.0, %v198_v30 }
  0x2c   : > { %v202_v36 = vsub.f32 %v190_v20, %v200_v32  ;;  %v203_v37 = vsub.f32 %v191_v21, %v201_v33 }
  0x2e   : > { %vm204_vm2 = vcmp.lt.f32.partialorder %v202_v36, 0.0  ;;  %vm205_vm3 = vcmp.lt.f32.partialorder %v203_v37, 0.0  ;;  %v210_v40 = vadd.f32 %v202_v36, %v199_v27  ;;  %v211_v41 = vadd.f32 %v203_v37, %v199_v27 }
  0x2f   : > { %v208_v43 = vsel %vm204_vm2, %v328_v34, %v197_v29  ;;  %v209_v44 = vsel %vm205_vm3, %v329_v35, %v198_v30 }
  0x30   : > { %v212_v45 = vsel %vm204_vm2, %v210_v40, %v202_v36  ;;  %v213_v46 = vsel %vm205_vm3, %v211_v41, %v203_v37  ;;  %v216_v47 = vadd.f32 1.0, %v208_v43  ;;  %v217_v48 = vadd.f32 1.0, %v209_v44 }
  0x31   : > { %vm214_vm4 = vcmp.ge.f32.partialorder %v212_v45, %v199_v27  ;;  %vm215_vm5 = vcmp.ge.f32.partialorder %v213_v46, %v199_v27  ;;  %v220_v49 = vsub.f32 %v212_v45, %v199_v27  ;;  %v221_v50 = vsub.f32 %v213_v46, %v199_v27 }
  0x32   : > { %v218_v52 = vsel %vm214_vm4, %v216_v47, %v208_v43  ;;  %v219_v53 = vsel %vm215_vm5, %v217_v48, %v209_v44 }
  0x33   : > { %v222_v55 = vsel %vm214_vm4, %v220_v49, %v212_v45  ;;  %v223_v56 = vsel %vm215_vm5, %v221_v50, %v213_v46  ;;  %v227_v57 = vmul.f32 %v224_v42, %v218_v52  ;;  %v228_v58 = vmul.f32 %v224_v42, %v219_v53 }
  0x34   : > { %v225_v59 = vmul.f32 %v224_v42, %v222_v55  ;;  %v226_v60 = vmul.f32 %v224_v42, %v223_v56 }
  0x36   : > { %v236_v61 = vsel %vm571_vm6, %v225_v59, %v227_v57  ;;  %v237_v62 = vsel %vm571_vm6, %v226_v60, %v228_v58  ;;  %v238_v63 = vsel %vm575_vm7, %v225_v59, %v227_v57  ;;  %v239_v0 = vsel %vm575_vm7, %v226_v60, %v228_v58 }
  0x9a   : > { %v243_v1 = vpop.permute.xlu0 %242 }
  0x9b   : > { %v250_v2 = vadd.f32 %v243_v1, %v236_v61  ;;  %v251_v3 = vadd.f32 %v243_v1, %v237_v62 }
  0x9d   : > { %254 = vst [vmem:[%s148_s6] sm:$0xff] %v250_v2  ;;  %255 = vst [vmem:[%s148_s6 + $0x8] sm:$0xff] %v251_v3 }
  0x9e   : > { %v248_v4 = vpop.permute.xlu0 %247 }
  0x9f   : > { %v252_v5 = vadd.f32 %v248_v4, %v238_v63  ;;  %v253_v6 = vadd.f32 %v248_v4, %v239_v0 }
  0xa1   : > { %256 = vst [vmem:[%s148_s6 + $0x10] sm:$0xf] %v252_v5  ;;  %257 = vst [vmem:[%s148_s6 + $0x18] sm:$0xf] %v253_v6 }
  0xa2   : > { %393 = shalt.err (!%p390_p4)
}
  0xa3   : > { %s394_s25 = scalar_lea.hbm %s594_s11, 512  ;;  %s398_s28 = scalar_lea.hbm %s640_s3, 1536 }
  0xa4   : > { %p395_p7 = scmp.ne.s32.totalorder %s594_s11, %s394_s25  ;;  %p399_p10 = scmp.lt.u32.totalorder %s594_s11, %s640_s3 }
  0xa5   : > { %p400_p11 = scmp.lt.u32.totalorder %s398_s28, %s394_s25  ;;  %p402_p13 = scmp.lt.u32.totalorder %s394_s25, %s594_s11 }
  0xa6   : > { %p396_p8 = pnand %p395_p7, %p507_p5 }
  0xa7   : > { %p401_p12 = por %p400_p11, %p399_p10 }
  0xa8   : > { %p397_p9 = pneg %p396_p8 }
  0xa9   : > { %p403_p0 = por %p402_p13, %p401_p12 }
  0xab   : > { %p404_p1 = pnand %p403_p0, %p397_p9 }
  0xad   : > { %407 = shalt.err (!%p404_p1)
}
  0xae   : > { %s446_s4 = smov 256   ;;  %s447_s5 = smov 768  }
  0xaf   : > { %s448_s6 = smov 16  }
  0xb0   : > { %336 = dma.vmem_to_hbm [thread:$0]  (%p507_p5), %s589_s7, 512, %s594_s11, %s596_s17, %s446_s4, %s447_s5, %s448_s6  }
  0xb1 PF: > { %p342_p2 = scmp.ge.s32.totalorder %s442_s15, 2  ;;  %s287_s8 = sand.u32 1, %s430_s12  }
  0xb2   : > { %s288_s9 = scalar_lea.sflag [#allocation3], %s287_s8 }
  0xb3   : > { %p339_p3 = pnand %p342_p2, %p511_p6 }
  0xb5   : > { %425 = dma.done.wait (!%p339_p3), %s288_s9, 512  }
  0xb6   : > { %427 = vsyncadd (!%p339_p3), %s288_s9, 4294966784  ;;  %p13_p4 = scmp.ge.s32.totalorder %s494_s18, 5   ;;  %s649_s12 = smov %s434_s13 }
  0xb7   : > { %s650_s13 = smov %s438_s14  ;;  %s651_s14 = smov %s505_s21 }
  0xb8   : > { %s652_s15 = smov %s494_s18  ;;  %15 = sbr.rel (!%p13_p4) target bundleno = 3 (0x3), region = 64 }
  0xbf   :  { %293 = vsyncpa [#allocation3], 1 }
  0xc0   :  { %295 = vsyncpa [#allocation3 + $0x1], 1 }

</bundles_post_ra>
